<compile_context>
chip_gen: v7x
topology: tpu7x:2x2x1
jax: 0.10.0
libtpu: 0.0.40
codegen_flags: <defaults>
</compile_context>

<pallas_src>
import jax
import jax.numpy as jnp
from jax.experimental import pallas as pl
from jax.experimental.pallas import tpu as pltpu
from typing import NamedTuple

LEAKY_SLOPE = 0.01  # torch.nn.LeakyReLU default negative_slope
LANE = 128          # lane width (last-dim alignment target)
SUBLANE = 8         # f32/bf16-friendly sublane alignment for the batch tile


def _round_up(v, m):
    return (v + m - 1) // m * m


# ---------------------------------------------------------------------------
# Kernel
# ---------------------------------------------------------------------------
def dae_kernel(x_ref, w1_ref, b1_ref, w2_ref, b2_ref, o_ref):
    # x_ref:  (TB, in_p)    bf16 batch tile (streamed)
    # w1_ref: (in_p, out_p) bf16, b1_ref: (1, out_p) f32   (VMEM resident)
    # w2_ref: (out_p, in_p) bf16, b2_ref: (1, in_p) f32    (VMEM resident)
    # o_ref:  (TB, in_p)    out_dtype

    # encoder: Linear (bf16 MXU, f32 accumulate) + bias + LeakyReLU in f32
    h = jnp.dot(x_ref[...], w1_ref[...], preferred_element_type=jnp.float32)
    h = h + b1_ref[...]
    h = jnp.maximum(h, LEAKY_SLOPE * h)          # LeakyReLU, single VPU max

    # decoder: Linear (bf16 MXU, f32 accumulate) + bias
    out = jnp.dot(h.astype(jnp.bfloat16), w2_ref[...],
                  preferred_element_type=jnp.float32)
    out = out + b2_ref[...]
    o_ref[...] = out.astype(o_ref.dtype)


# ---------------------------------------------------------------------------
# Parameter preparation (done ONCE, outside the forward pass)
# ---------------------------------------------------------------------------
class DAEParams(NamedTuple):
    w1: jax.Array   # (in_p, out_p)  bf16, zero padded
    b1: jax.Array   # (1, out_p)     f32,  zero padded
    w2: jax.Array   # (out_p, in_p)  bf16, zero padded
    b2: jax.Array   # (1, in_p)      f32,  zero padded
    in_dim: int
    out_dim: int


def prepare_dae_params(w1, b1, w2, b2, *, lane_multiple=None):
    """Pad feature dims to lane multiples and cast weights to bf16 (once)."""
    in_dim, out_dim = w1.shape
    if lane_multiple is None:
        # 256-wide MXU on v6e/v7x: only worth padding further when the layer is
        # big enough to ever be MXU-bound; otherwise keep streamed bytes minimal.
        lane_multiple = 256 if min(in_dim, out_dim) >= 1024 else LANE
    in_p = _round_up(in_dim, lane_multiple)
    out_p = _round_up(out_dim, lane_multiple)

    # Zero padding is mathematically exact: padded rows/cols contribute nothing.
    w1_p = jnp.pad(w1.astype(jnp.bfloat16),
                   ((0, in_p - in_dim), (0, out_p - out_dim)))
    w2_p = jnp.pad(w2.astype(jnp.bfloat16),
                   ((0, out_p - out_dim), (0, in_p - in_dim)))
    b1_p = jnp.pad(jnp.reshape(b1, (1, -1)).astype(jnp.float32),
                   ((0, 0), (0, out_p - out_dim)))
    b2_p = jnp.pad(jnp.reshape(b2, (1, -1)).astype(jnp.float32),
                   ((0, 0), (0, in_p - in_dim)))
    return DAEParams(w1_p, b1_p, w2_p, b2_p, int(in_dim), int(out_dim))


# ---------------------------------------------------------------------------
# Forward pass
# ---------------------------------------------------------------------------
def dae_forward(x, params: DAEParams, *, tile_b_max=512, out_dtype=None):
    """x: (B, in_dim). Returns (B, in_dim) in out_dtype (default: x.dtype)."""
    B, in_dim = x.shape
    assert in_dim == params.in_dim, "input feature dim mismatch"
    in_p, out_p = params.w1.shape
    out_dtype = x.dtype if out_dtype is None else out_dtype

    # Stream x as bf16 (halves read traffic); zero-pad feature dim only if the
    # layer isn't already lane-aligned (pad is exact: matching weight rows are 0).
    x_p = x.astype(jnp.bfloat16)
    if in_p != in_dim:
        x_p = jnp.pad(x_p, ((0, 0), (0, in_p - in_dim)))

    # Batch tiling: large tiles for HBM roofline, but keep >=2 grid steps when B
    # allows so both TensorCores on v7x get work on the 'parallel' axis.
    tile_b = max(SUBLANE, min(tile_b_max, _round_up(pl.cdiv(B, 2), SUBLANE)))
    grid = (pl.cdiv(B, tile_b),)  # partial trailing block is masked by Pallas

    # Explicit scoped-VMEM budget (v5e default is only 16 MiB). Conservatively
    # assume double buffering of everything when sizing the limit.
    bytes_w = 2 * (params.w1.size + params.w2.size) \
        + 4 * (params.b1.size + params.b2.size)
    bytes_io = tile_b * in_p * (2 + jnp.dtype(out_dtype).itemsize)
    est = 2 * (bytes_w + bytes_io)
    vmem_limit = int(min(max(est + est // 4 + (4 << 20), 32 << 20), 100 << 20))

    def run(weight_pipeline_mode):
        kw = {} if weight_pipeline_mode is None else {
            "pipeline_mode": weight_pipeline_mode}

        def resident(shape):  # constant block -> stays VMEM-resident across grid
            return pl.BlockSpec(shape, lambda i: (0, 0), **kw)

        return pl.pallas_call(
            dae_kernel,
            out_shape=jax.ShapeDtypeStruct((B, in_p), out_dtype),
            grid_spec=pl.GridSpec(
                grid=grid,
                in_specs=[
                    pl.BlockSpec((tile_b, in_p), lambda i: (i, 0)),  # x (streamed)
                    resident((in_p, out_p)),                         # w1
                    resident((1, out_p)),                            # b1
                    resident((out_p, in_p)),                         # w2
                    resident((1, in_p)),                             # b2
                ],
                out_specs=pl.BlockSpec((tile_b, in_p), lambda i: (i, 0)),
            ),
            compiler_params=pltpu.CompilerParams(
                dimension_semantics=("parallel",),
                vmem_limit_bytes=vmem_limit,
            ),
        )(x_p, params.w1, params.b1, params.w2, params.b2)

    try:
        # Resident blocks don't need double buffering -> Buffered(1) halves
        # their VMEM footprint (important on v7x's 64 MiB/TC).
        out = run(pl.Buffered(1))
    except Exception:
        # Portability fallback for JAX builds where pipeline_mode is not
        # supported on this lowering path; identical semantics.
        out = run(None)

    if in_p != in_dim:
        out = out[:, :in_dim]  # drop padded feature columns (no-op if aligned)
    return out


# ---------------------------------------------------------------------------
# Init + references
# ---------------------------------------------------------------------------
def init_dae_params(key, in_dim, out_dim, dtype=jnp.float32):
    """Deterministic init mimicking torch.nn.Linear default U[-1/sqrt(fan_in), +1/sqrt(fan_in)]."""
    k1, k2, k3, k4 = jax.random.split(key, 4)
    bound1 = 1.0 / jnp.sqrt(in_dim)
    bound2 = 1.0 / jnp.sqrt(out_dim)
    w1 = jax.random.uniform(k1, (in_dim, out_dim), dtype, -bound1, bound1)
    b1 = jax.random.uniform(k2, (out_dim,), dtype, -bound1, bound1)
    w2 = jax.random.uniform(k3, (out_dim, in_dim), dtype, -bound2, bound2)
    b2 = jax.random.uniform(k4, (in_dim,), dtype, -bound2, bound2)
    return w1, b1, w2, b2


def dae_reference_f32(x, w1, b1, w2, b2):
    """Full-precision reference (matches the PyTorch f32 module)."""
    h = x @ w1 + b1[None, :]
    h = jnp.where(h > 0, h, LEAKY_SLOPE * h)
    return h @ w2 + b2[None, :]


def dae_reference_bf16(x, w1, b1, w2, b2):
    """Reference using the same bf16-input / f32-accumulate matmul recipe as the kernel."""
    h = jnp.dot(x.astype(jnp.bfloat16), w1.astype(jnp.bfloat16),
                preferred_element_type=jnp.float32) + b1[None, :]
    h = jnp.where(h > 0, h, LEAKY_SLOPE * h)
    out = jnp.dot(h.astype(jnp.bfloat16), w2.astype(jnp.bfloat16),
                  preferred_element_type=jnp.float32) + b2[None, :]
    return out


if __name__ == "__main__":
    # TODO(synk): train_DAE (Adam, StepLR, MSELoss) and salt_and_pepper noise are
    # host-side training utilities, not part of the forward pass, so they are
    # not kernelized.
    key = jax.random.PRNGKey(0)
    kx, kp = jax.random.split(key)

    batch, in_dim, out_dim = 16, 32, 16
    x = jax.random.normal(kx, (batch, in_dim), jnp.float32)
    w1, b1, w2, b2 = init_dae_params(kp, in_dim, out_dim)

    params = prepare_dae_params(w1, b1, w2, b2)   # pad + bf16 cast, once
    out = dae_forward(x, params)
    out = jax.block_until_ready(out)
    assert out.shape == x.shape
    assert out.dtype == x.dtype

    # Tight check against the same bf16/f32-accumulate recipe.
    ref_bf16 = dae_reference_bf16(x, w1, b1, w2, b2)
    assert jnp.allclose(out, ref_bf16, atol=1e-3, rtol=1e-3), "mismatch vs bf16 reference"

    # Looser sanity check against the full-precision torch-equivalent reference
    # (bf16 input rounding gives ~1e-2-level differences).
    ref_f32 = dae_reference_f32(x, w1, b1, w2, b2)
    assert jnp.allclose(out, ref_f32, atol=3e-2, rtol=3e-2), "mismatch vs f32 reference"

    print("KERNEL_OK")
</pallas_src>

<mosaic_0001>
module attributes {stable_mosaic.version = 11 : i64} {
  func.func @dae_kernel(%arg0: i32, %arg1: memref<8x128xbf16, #tpu.memory_space<vmem>>, %arg2: memref<128x128xbf16, #tpu.memory_space<vmem>>, %arg3: memref<1x128xf32, #tpu.memory_space<vmem>>, %arg4: memref<128x128xbf16, #tpu.memory_space<vmem>>, %arg5: memref<1x128xf32, #tpu.memory_space<vmem>>, %arg6: memref<8x128xf32, #tpu.memory_space<vmem>>) attributes {dimension_semantics = [#tpu.dimension_semantics<parallel>], iteration_bounds = array<i64: 2>, scalar_prefetch = 0 : i64, scratch_operands = 0 : i64, tpu.core_type = #tpu.core_type<tc>, window_params = [{transform_indices = @transform_0, window_bounds = array<i64: 8, 128>}, {pipeline_mode = #tpu.pipeline_mode<synchronous>, transform_indices = @transform_1, window_bounds = array<i64: 128, 128>}, {pipeline_mode = #tpu.pipeline_mode<synchronous>, transform_indices = @transform_2, window_bounds = array<i64: 1, 128>}, {pipeline_mode = #tpu.pipeline_mode<synchronous>, transform_indices = @transform_3, window_bounds = array<i64: 128, 128>}, {pipeline_mode = #tpu.pipeline_mode<synchronous>, transform_indices = @transform_4, window_bounds = array<i64: 1, 128>}, {transform_indices = @transform_5, window_bounds = array<i64: 8, 128>}]} {
    %c0 = arith.constant 0 : index
    %c0_0 = arith.constant 0 : index
    %0 = vector.load %arg1[%c0, %c0_0] : memref<8x128xbf16, #tpu.memory_space<vmem>>, vector<8x128xbf16>
    %c0_1 = arith.constant 0 : index
    %c0_2 = arith.constant 0 : index
    %1 = vector.load %arg2[%c0_1, %c0_2] : memref<128x128xbf16, #tpu.memory_space<vmem>>, vector<128x128xbf16>
    %cst = arith.constant dense<0.000000e+00> : vector<8x128xf32>
    %2 = tpu.matmul %0, %1, %cst {dimension_numbers = #tpu.dot_dimension_numbers<[1], [0], [0], [1], [0, 0, 1, 1], [], []>} : vector<8x128xbf16>, vector<128x128xbf16>, vector<8x128xf32> -> vector<8x128xf32>
    %c0_3 = arith.constant 0 : index
    %c0_4 = arith.constant 0 : index
    %3 = vector.load %arg3[%c0_3, %c0_4] : memref<1x128xf32, #tpu.memory_space<vmem>>, vector<1x128xf32>
    %4 = vector.broadcast %3 : vector<1x128xf32> to vector<8x128xf32>
    %5 = arith.addf %2, %4 : vector<8x128xf32>
    %cst_5 = arith.constant 0.00999999977 : f32
    %6 = vector.broadcast %cst_5 : f32 to vector<8x128xf32>
    %7 = arith.mulf %6, %5 : vector<8x128xf32>
    %8 = arith.maximumf %5, %7 : vector<8x128xf32>
    %9 = arith.truncf %8 : vector<8x128xf32> to vector<8x128xbf16>
    %c0_6 = arith.constant 0 : index
    %c0_7 = arith.constant 0 : index
    %10 = vector.load %arg4[%c0_6, %c0_7] : memref<128x128xbf16, #tpu.memory_space<vmem>>, vector<128x128xbf16>
    %cst_8 = arith.constant dense<0.000000e+00> : vector<8x128xf32>
    %11 = tpu.matmul %9, %10, %cst_8 {dimension_numbers = #tpu.dot_dimension_numbers<[1], [0], [0], [1], [0, 0, 1, 1], [], []>} : vector<8x128xbf16>, vector<128x128xbf16>, vector<8x128xf32> -> vector<8x128xf32>
    %c0_9 = arith.constant 0 : index
    %c0_10 = arith.constant 0 : index
    %12 = vector.load %arg5[%c0_9, %c0_10] : memref<1x128xf32, #tpu.memory_space<vmem>>, vector<1x128xf32>
    %13 = vector.broadcast %12 : vector<1x128xf32> to vector<8x128xf32>
    %14 = arith.addf %11, %13 : vector<8x128xf32>
    %c0_11 = arith.constant 0 : index
    %c0_12 = arith.constant 0 : index
    %15 = vector.load %arg6[%c0_11, %c0_12] : memref<8x128xf32, #tpu.memory_space<vmem>>, vector<8x128xf32>
    tpu.vector_store %arg6[%c0_11, %c0_12], %14 {strides = array<i32>} : memref<8x128xf32, #tpu.memory_space<vmem>>, vector<8x128xf32>,
    return
  }
  func.func @transform_0(%arg0: i32) -> (i32, i32) {
    %c0_i32 = arith.constant 0 : i32
    %c0_i32_0 = arith.constant 0 : i32
    return %arg0, %c0_i32 : i32, i32
  }
  func.func @transform_1(%arg0: i32) -> (i32, i32) {
    %c0_i32 = arith.constant 0 : i32
    %c0_i32_0 = arith.constant 0 : i32
    %c0_i32_1 = arith.constant 0 : i32
    return %c0_i32, %c0_i32_0 : i32, i32
  }
  func.func @transform_2(%arg0: i32) -> (i32, i32) {
    %c0_i32 = arith.constant 0 : i32
    %c0_i32_0 = arith.constant 0 : i32
    %c0_i32_1 = arith.constant 0 : i32
    return %c0_i32, %c0_i32_0 : i32, i32
  }
  func.func @transform_3(%arg0: i32) -> (i32, i32) {
    %c0_i32 = arith.constant 0 : i32
    %c0_i32_0 = arith.constant 0 : i32
    %c0_i32_1 = arith.constant 0 : i32
    return %c0_i32, %c0_i32_0 : i32, i32
  }
  func.func @transform_4(%arg0: i32) -> (i32, i32) {
    %c0_i32 = arith.constant 0 : i32
    %c0_i32_0 = arith.constant 0 : i32
    %c0_i32_1 = arith.constant 0 : i32
    return %c0_i32, %c0_i32_0 : i32, i32
  }
  func.func @transform_5(%arg0: i32) -> (i32, i32) {
    %c0_i32 = arith.constant 0 : i32
    %c0_i32_0 = arith.constant 0 : i32
    return %arg0, %c0_i32 : i32, i32
  }
}

module attributes {stable_mosaic.version = 11 : i64} {
  func.func @dae_kernel(%arg0: i32, %arg1: memref<8x128xbf16, #tpu.memory_space<vmem>>, %arg2: memref<128x128xbf16, #tpu.memory_space<vmem>>, %arg3: memref<1x128xf32, #tpu.memory_space<vmem>>, %arg4: memref<128x128xbf16, #tpu.memory_space<vmem>>, %arg5: memref<1x128xf32, #tpu.memory_space<vmem>>, %arg6: memref<8x128xf32, #tpu.memory_space<vmem>>) attributes {dimension_semantics = [#tpu.dimension_semantics<parallel>], iteration_bounds = array<i64: 2>, scalar_prefetch = 0 : i64, scratch_operands = 0 : i64, tpu.core_type = #tpu.core_type<tc>, window_params = [{transform_indices = @transform_0, window_bounds = array<i64: 8, 128>}, {pipeline_mode = #tpu.pipeline_mode<synchronous>, transform_indices = @transform_1, window_bounds = array<i64: 128, 128>}, {pipeline_mode = #tpu.pipeline_mode<synchronous>, transform_indices = @transform_2, window_bounds = array<i64: 1, 128>}, {pipeline_mode = #tpu.pipeline_mode<synchronous>, transform_indices = @transform_3, window_bounds = array<i64: 128, 128>}, {pipeline_mode = #tpu.pipeline_mode<synchronous>, transform_indices = @transform_4, window_bounds = array<i64: 1, 128>}, {transform_indices = @transform_5, window_bounds = array<i64: 8, 128>}]} {
    %c0 = arith.constant 0 : index
    %c0_0 = arith.constant 0 : index
    %0 = vector.load %arg1[%c0, %c0_0] : memref<8x128xbf16, #tpu.memory_space<vmem>>, vector<8x128xbf16>
    %c0_1 = arith.constant 0 : index
    %c0_2 = arith.constant 0 : index
    %1 = vector.load %arg2[%c0_1, %c0_2] : memref<128x128xbf16, #tpu.memory_space<vmem>>, vector<128x128xbf16>
    %cst = arith.constant dense<0.000000e+00> : vector<8x128xf32>
    %2 = tpu.matmul %0, %1, %cst {dimension_numbers = #tpu.dot_dimension_numbers<[1], [0], [0], [1], [0, 0, 1, 1], [], []>} : vector<8x128xbf16>, vector<128x128xbf16>, vector<8x128xf32> -> vector<8x128xf32>
    %c0_3 = arith.constant 0 : index
    %c0_4 = arith.constant 0 : index
    %3 = vector.load %arg3[%c0_3, %c0_4] : memref<1x128xf32, #tpu.memory_space<vmem>>, vector<1x128xf32>
    %4 = vector.broadcast %3 : vector<1x128xf32> to vector<8x128xf32>
    %5 = arith.addf %2, %4 : vector<8x128xf32>
    %cst_5 = arith.constant 0.00999999977 : f32
    %6 = vector.broadcast %cst_5 : f32 to vector<8x128xf32>
    %7 = arith.mulf %6, %5 : vector<8x128xf32>
    %8 = arith.maximumf %5, %7 : vector<8x128xf32>
    %9 = arith.truncf %8 : vector<8x128xf32> to vector<8x128xbf16>
    %c0_6 = arith.constant 0 : index
    %c0_7 = arith.constant 0 : index
    %10 = vector.load %arg4[%c0_6, %c0_7] : memref<128x128xbf16, #tpu.memory_space<vmem>>, vector<128x128xbf16>
    %cst_8 = arith.constant dense<0.000000e+00> : vector<8x128xf32>
    %11 = tpu.matmul %9, %10, %cst_8 {dimension_numbers = #tpu.dot_dimension_numbers<[1], [0], [0], [1], [0, 0, 1, 1], [], []>} : vector<8x128xbf16>, vector<128x128xbf16>, vector<8x128xf32> -> vector<8x128xf32>
    %c0_9 = arith.constant 0 : index
    %c0_10 = arith.constant 0 : index
    %12 = vector.load %arg5[%c0_9, %c0_10] : memref<1x128xf32, #tpu.memory_space<vmem>>, vector<1x128xf32>
    %13 = vector.broadcast %12 : vector<1x128xf32> to vector<8x128xf32>
    %14 = arith.addf %11, %13 : vector<8x128xf32>
    %c0_11 = arith.constant 0 : index
    %c0_12 = arith.constant 0 : index
    %15 = vector.load %arg6[%c0_11, %c0_12] : memref<8x128xf32, #tpu.memory_space<vmem>>, vector<8x128xf32>
    tpu.vector_store %arg6[%c0_11, %c0_12], %14 {strides = array<i32>} : memref<8x128xf32, #tpu.memory_space<vmem>>, vector<8x128xf32>,
    return
  }
  func.func @transform_0(%arg0: i32) -> (i32, i32) {
    %c0_i32 = arith.constant 0 : i32
    %c0_i32_0 = arith.constant 0 : i32
    return %arg0, %c0_i32 : i32, i32
  }
  func.func @transform_1(%arg0: i32) -> (i32, i32) {
    %c0_i32 = arith.constant 0 : i32
    %c0_i32_0 = arith.constant 0 : i32
    %c0_i32_1 = arith.constant 0 : i32
    return %c0_i32, %c0_i32_0 : i32, i32
  }
  func.func @transform_2(%arg0: i32) -> (i32, i32) {
    %c0_i32 = arith.constant 0 : i32
    %c0_i32_0 = arith.constant 0 : i32
    %c0_i32_1 = arith.constant 0 : i32
    return %c0_i32, %c0_i32_0 : i32, i32
  }
  func.func @transform_3(%arg0: i32) -> (i32, i32) {
    %c0_i32 = arith.constant 0 : i32
    %c0_i32_0 = arith.constant 0 : i32
    %c0_i32_1 = arith.constant 0 : i32
    return %c0_i32, %c0_i32_0 : i32, i32
  }
  func.func @transform_4(%arg0: i32) -> (i32, i32) {
    %c0_i32 = arith.constant 0 : i32
    %c0_i32_0 = arith.constant 0 : i32
    %c0_i32_1 = arith.constant 0 : i32
    return %c0_i32, %c0_i32_0 : i32, i32
  }
  func.func @transform_5(%arg0: i32) -> (i32, i32) {
    %c0_i32 = arith.constant 0 : i32
    %c0_i32_0 = arith.constant 0 : i32
    return %arg0, %c0_i32 : i32, i32
  }
}

</mosaic_0001>

<bundles_post_ra>
// kernel: tpu_custom_call.1
= control target key start
LH: loop header
LB: loop body
LE: loop exit
PB: predicated region body
PF: predicated region fallthrough
CT: control target
= control target key end

     0   :  { %10 = vsyncpa [#allocation3], 0  ;;  %s1214_s0 = inlined_call_operand.hbm [shape: bf16[16,128], index: 0, kind: input, shape index: {}]   ;;  %s1215_s1 = inlined_call_operand.hbm [shape: bf16[128,128], index: 1, kind: input, shape index: {}]   ;;  %s1216_s2 = inlined_call_operand.vmem [shape: f32[1,128], index: 2, kind: input, shape index: {}]   ;;  %s1217_s3 = inlined_call_operand.hbm [shape: bf16[128,128], index: 3, kind: input, shape index: {}]   ;;  %s1218_s4 = inlined_call_operand.vmem [shape: f32[1,128], index: 4, kind: input, shape index: {}]   ;;  %s1219_s5 = inlined_call_operand.hbm [shape: f32[16,128], index: 5, kind: output, shape index: {}]  }
   0x1   :  { %12 = vsyncpa [#allocation3 + $0x1], 0 }
   0x2   :  { %13 = vsyncpa [#allocation6], 0 }
   0x3   :  { %14 = vsyncpa [#allocation4], 0 }
   0x4   :  { %16 = vsyncpa [#allocation4 + $0x1], 0  ;;  %s975_s18 = smov 0   ;;  %s977_s19 = smov 0  }
   0x5   :  { %s979_s20 = smov 0   ;;  %s981_s21 = smov 0  }
   0x6 LB: > { %s996_s22 = sadd.s32 4294967295, %s935_s21   ;;  %s600_s23 = sadd.s32 4294967294, %s935_s21   ;;  %s935_s21 = sphi %s981_s21, %s1239_s21   ;;  %s931_s20 = sphi %s979_s20, %s1238_s20   ;;  %s927_s19 = sphi %s977_s19, %s1237_s19   ;;  %s923_s18 = sphi %s975_s18, %s1236_s18  }
   0x7   : > { %p42_p0 = scmp.ne.s32.totalorder %s927_s19, %s923_s18  ;;  %p1220_p1 = scmp.eq.s32.totalorder %s996_s22, 0 }
   0x8   : > { %p156_p3 = scmp.eq.s32.totalorder %s600_s23, 1  ;;  %p601_p5 = scmp.ge.s32.totalorder %s935_s21, 1 }
   0x9   : > { %p1005_p4 = por %p1220_p1, %p42_p0  ;;  %p163_p7 = scmp.lt.s32.totalorder %s935_s21, 3 }
   0xa   : > { %p1010_p6 = por %p156_p3, %p42_p0  ;;  %s937_s27 = smov [#allocation5]  }
   0xb   : > { %s1223_s24 = scalar_select %p1005_p4, 1, 0 }
   0xc   : > { %s1224_s25 = scalar_select %p1010_p6, 1, 0 }
   0xd   : > { %p1015_p8 = pnand %p601_p5, %p163_p7  ;;  %s175_s28 = sshll.u32 %s937_s27, 4  ;;  %s1019_s28 = int_to_ptr.vmem [resolvable:$true] %s175_s28 }
   0xe   : > { %s938_s30 = smov [#allocation7]   ;;  %s779_s9 = scalar_lea.hbm %s1215_s1, 1024 }
   0xf   : > { %p704_p9 = pneg %p1015_p8  ;;  %s191_s6 = sshll.u32 %s938_s30, 4  ;;  %s1030_s6 = int_to_ptr.vmem [resolvable:$true] %s191_s6 }
  0x10   : > { %p780_p12 = scmp.ne.s32.totalorder %s1215_s1, %s779_s9  ;;  %p786_p5 = scmp.lt.u32.totalorder %s779_s9, %s1215_s1 }
  0x11   : > { %p1026_p11 = pnand %p704_p9, %p1220_p1 }
  0x13   : > { %p781_p13 = pneg %p1026_p11 }
  0x15   : > { %p782_p0 = pnand %p781_p13, %p780_p12 }
  0x17   : > { %p783_p3 = pneg %p782_p0 }
  0x19   : > { %p788_p7 = pnand %p786_p5, %p783_p3 }
  0x1b   : > { %791 = shalt.err (!%p788_p7)
}
  0x1c   : > { %s792_s14 = scalar_lea.vmem %s1019_s28, 1024  ;;  %p800_p2 = scmp.lt.s32.totalorder %s1019_s28, %s1019_s28 }
  0x1d   : > { %p793_p9 = scmp.ne.s32.totalorder %s1019_s28, %s792_s14  ;;  %p801_p12 = scmp.lt.s32.totalorder %s792_s14, %s792_s14 }
  0x1f   : > { %p795_p10 = pnand %p793_p9, %p781_p13  ;;  %p802_p0 = por %p801_p12, %p800_p2 }
  0x21   : > { %p796_p1 = pneg %p795_p10 }
  0x23   : > { %p803_p6 = pnand %p802_p0, %p796_p1 }
  0x25   : > { %806 = shalt.err (!%p803_p6)
}
  0x26   : > { %s939_s15 = smov 64   ;;  %s940_s16 = smov 4  }
  0x27   : > { %707 = dma.hbm_to_vmem [thread:$0]  (!%p1026_p11), %s1215_s1, 1024, %s1019_s28, [#allocation6], %s939_s15, %s939_s15, %s940_s16  }
  0x28   : > { %s807_s7 = scalar_lea.hbm %s1217_s3, 1024 }
  0x29   : > { %p808_p2 = scmp.ne.s32.totalorder %s1217_s3, %s807_s7  ;;  %p814_p10 = scmp.lt.u32.totalorder %s807_s7, %s1217_s3 }
  0x2b   : > { %p810_p1 = pnand %p808_p2, %p781_p13 }
  0x2d   : > { %p811_p6 = pneg %p810_p1 }
  0x2f   : > { %p816_p3 = pnand %p814_p10, %p811_p6 }
  0x31   : > { %819 = shalt.err (!%p816_p3)
}
  0x32   : > { %s820_s28 = scalar_lea.vmem %s1030_s6, 1024  ;;  %p828_p12 = scmp.lt.s32.totalorder %s1030_s6, %s1030_s6 }
  0x33   : > { %p821_p5 = scmp.ne.s32.totalorder %s1030_s6, %s820_s28  ;;  %p829_p0 = scmp.lt.s32.totalorder %s820_s28, %s820_s28 }
  0x35   : > { %p823_p7 = pnand %p821_p5, %p781_p13  ;;  %p830_p2 = por %p829_p0, %p828_p12 }
  0x37   : > { %p824_p9 = pneg %p823_p7 }
  0x39   : > { %p831_p1 = pnand %p830_p2, %p824_p9 }
  0x3b   : > { %834 = shalt.err (!%p831_p1)
}
  0x3c   : > { %710 = dma.hbm_to_vmem [thread:$0]  (!%p1026_p11), %s1217_s3, 1024, %s1030_s6, [#allocation6], %s939_s15, %s939_s15, %s940_s16  }
  0x3d   : > { %s1085_s14 = sadd.s32 1, %s935_s21   ;;  %s29_s29 = sadd.s32 1, %s931_s20 }
  0x3e   : > { %s26_s17 = ssub.s32 %s935_s21, %s1085_s14  ;;  %p36_p13 = scmp.ne.s32.totalorder %s931_s20, %s927_s19 }
  0x3f   : > { %p27_p6 = scmp.eq.s32.totalorder %s26_s17, 0  ;;  %p37_p10 = scmp.eq.s32.totalorder %s935_s21, 0 }
  0x40   : > { %p1227_p3 = scmp.eq.s32.totalorder %s996_s22, 1  ;;  %p721_p7 = scmp.lt.s32.totalorder %s935_s21, 2 }
  0x41   : > { %s1101_s27 = scalar_select %p27_p6, %s931_s20, %s29_s29  }
  0x42   : > { %p1095_p5 = por %p1227_p3, %p36_p13  ;;  %p38_p9 = por %p37_p10, %p36_p13 }
  0x43   : > { %s208_s30 = sand.u32 1, %s931_s20   ;;  %s606_s6 = sshll.u32 %s935_s21, 6 }
  0x44   : > { %s1228_s23 = scalar_select %p1095_p5, 1, 0 }
  0x45   : > { %s605_s7 = sshll.u32 %s208_s30, 2  ;;  %s1108_s8 = scalar_lea.hbm %s1214_s0, %s606_s6 }
  0x46   : > { %s212_s9 = scalar_lea.vmem [#allocation2], %s605_s7  ;;  %p1112_p11 = pnand %p721_p7, %p38_p9 }
  0x47   : > { %s219_s10 = sshll.u32 %s212_s9, 4  ;;  %s209_s28 = scalar_lea.sflag [#allocation3], %s208_s30  ;;  %s1110_s10 = int_to_ptr.vmem [resolvable:$true] %s219_s10 }
  0x48   : > { %s835_s12 = scalar_lea.hbm %s1108_s8, 64  ;;  %p837_p0 = pneg %p1112_p11 }
  0x49   : > { %p836_p12 = scmp.ne.s32.totalorder %s1108_s8, %s835_s12  ;;  %s840_s17 = scalar_lea.hbm %s1214_s0, 128 }
  0x4a   : > { %p841_p13 = scmp.lt.u32.totalorder %s1108_s8, %s1214_s0  ;;  %p842_p6 = scmp.lt.u32.totalorder %s840_s17, %s835_s12 }
  0x4b   : > { %p838_p2 = pnand %p837_p0, %p836_p12  ;;  %p844_p3 = scmp.lt.u32.totalorder %s835_s12, %s1108_s8 }
  0x4c   : > { %p843_p10 = por %p842_p6, %p841_p13 }
  0x4d   : > { %p839_p1 = pneg %p838_p2 }
  0x4e   : > { %p845_p7 = por %p844_p3, %p843_p10 }
  0x50   : > { %p846_p9 = pnand %p845_p7, %p839_p1 }
  0x52   : > { %849 = shalt.err (!%p846_p9)
}
  0x53   : > { %s850_s30 = scalar_lea.vmem %s1110_s10, 64  ;;  %s941_s15 = smov [#allocation2]  }
  0x54   : > { %p851_p12 = scmp.ne.s32.totalorder %s1110_s10, %s850_s30  ;;  %s855_s16 = sshll.u32 %s941_s15, 4  ;;  %s856_s16 = int_to_ptr.vmem [resolvable:$false] %s855_s16 }
  0x55   : > { %s857_s9 = scalar_lea.vmem %s856_s16, 128  ;;  %p858_p4 = scmp.lt.s32.totalorder %s1110_s10, %s856_s16 }
  0x56   : > { %p853_p2 = pnand %p851_p12, %p837_p0  ;;  %p859_p13 = scmp.lt.s32.totalorder %s857_s9, %s850_s30 }
  0x58   : > { %p854_p5 = pneg %p853_p2  ;;  %p860_p6 = por %p859_p13, %p858_p4 }
  0x5a   : > { %p861_p10 = pnand %p860_p6, %p854_p5 }
  0x5c   : > { %864 = shalt.err (!%p861_p10)
}
  0x5d   : > { %714 = dma.hbm_to_vmem [thread:$0]  (!%p1112_p11), %s1108_s8, 64, %s1110_s10, %s209_s28  }
  0x5e   : > { %228 = sbr.rel (%p1015_p8) target bundleno = 587 (0x24b), region = 40  ;;  %s1144_s12 = sand.u32 (!%p1015_p8), 1, %s927_s19  }
  0x5f   : > { %s608_s13 = sshll.u32 (!%p1015_p8), %s1144_s12, 2  ;;  %s231_s29 = scalar_lea.sflag (!%p1015_p8), [#allocation3], %s1144_s12 }
  0x60   : > { %s1148_s17 = scalar_lea.vmem (!%p1015_p8), [#allocation2], %s608_s13  ;;  %p1230_p4 = scmp.ne.s32.totalorder (!%p1015_p8), %s1223_s24, 0 }
  0x65   : > { %910 = dma.done.wait (%p1230_p4), %s231_s29, 64  }
  0x66   : > { %912 = vsyncadd (%p1230_p4), %s231_s29, 4294967232  ;;  %p1231_p5 = scmp.eq.s32.totalorder %s996_s22, 0 }
  0x68   : > { %914 = dma.done.wait (%p1231_p5), [#allocation6], 2048   ;;  %p1232_p8 = pmov %p1231_p5 }
  0x69   : > { %v942_v0 = vmov 0.0   ;;  %vm943_vm0 = vmmov 0   ;;  %v763_v1 = vld [vmem:[#allocation5] sm:$0xff]   ;;  %v764_v2 = vld [vmem:[#allocation5 + $0x8] sm:$0xff]   ;;  %v765_v3 = vld [vmem:[#allocation5 + $0x10] sm:$0xff]   ;;  %s611_s8 = sshll.u32 %s1144_s12, 3 }
  0x6a   : > { %916 = vsyncadd (%p1232_p8), [#allocation6], 4294965248  ;;  %652 = vmatprep.subr.bf16.mxu0 %v942_v0  ;;  %668 = vmatprep.mubr.msk.bf16.mxu0 %vm943_vm0, %v942_v0  ;;  %v771_v4 = vld [vmem:[#allocation7] sm:$0xff]   ;;  %v766_v5 = vld [vmem:[#allocation5 + $0x18] sm:$0xff]   ;;  %s631_s28 = sshll.u32 %s996_s22, 7  ;;  %s268_s7 = scalar_lea.vmem [#allocation8], %s611_s8 }
  0x6b   : > { %672 = vmatprep.subr.bf16.mxu1 %v942_v0  ;;  %688 = vmatprep.mubr.msk.bf16.mxu1 %vm943_vm0, %v942_v0  ;;  %v772_v6 = vld [vmem:[#allocation7 + $0x8] sm:$0xff]   ;;  %v767_v7 = vld [vmem:[#allocation5 + $0x20] sm:$0xff]   ;;  %v773_v8 = vld [vmem:[#allocation7 + $0x10] sm:$0xff]   ;;  %s511_s6 = sshll.u32 %s268_s7, 4  ;;  %s1170_s16 = scalar_lea.hbm %s1219_s5, %s631_s28  ;;  %s1172_s6 = int_to_ptr.vmem [resolvable:$true] %s511_s6 }
  0x6c   : > { %653 = vmatpush3.bf16.msra.mxu0 %v763_v1  ;;  %673 = vmatpush3.bf16.msra.mxu1 %v771_v4  ;;  %v768_v9 = vld [vmem:[#allocation5 + $0x28] sm:$0xff]   ;;  %v774_v10 = vld [vmem:[#allocation7 + $0x18] sm:$0xff]   ;;  %v769_v11 = vld [vmem:[#allocation5 + $0x30] sm:$0xff]   ;;  %s498_s9 = scalar_lea.sflag [#allocation4], %s1144_s12  ;;  %s865_s22 = scalar_lea.vmem %s1172_s6, 128 }
  0x6d   : > { %654 = vmatprep.subr.bf16.mxu0 %v942_v0  ;;  %674 = vmatprep.subr.bf16.mxu1 %v942_v0  ;;  %v775_v12 = vld [vmem:[#allocation7 + $0x20] sm:$0xff]   ;;  %v770_v13 = vld [vmem:[#allocation5 + $0x38] sm:$0xff]   ;;  %v776_v14 = vld [vmem:[#allocation7 + $0x28] sm:$0xff]   ;;  %p866_p11 = scmp.ne.s32.totalorder %s1172_s6, %s865_s22  ;;  %p1233_p0 = scmp.ne.s32.totalorder %s1228_s23, 0 }
  0x6e   : > { %v270_v15 = vld [vmem:[%s1148_s17] sm:$0xf]  ;;  %v777_v16 = vld [vmem:[#allocation7 + $0x30] sm:$0xff]   ;;  %s944_s13 = smov [#allocation8]  }
  0x6f   : > { %v778_v17 = vld [vmem:[#allocation7 + $0x38] sm:$0xff]   ;;  %p867_p1 = pnand %p866_p11, %p1233_p0  ;;  %s869_s29 = sshll.u32 %s944_s13, 4  ;;  %s870_s29 = int_to_ptr.vmem [resolvable:$false] %s869_s29 }
  0x70   : > { %655 = vmatpush3.bf16.msra.mxu0 %v764_v2  ;;  %675 = vmatpush3.bf16.msra.mxu1 %v772_v6  ;;  %v612_v18 = vld [vmem:[%s1216_s2] ss:$0 sm:$0xff]  ;;  %s871_s17 = scalar_lea.vmem %s870_s29, 256  ;;  %p872_p7 = scmp.lt.s32.totalorder %s1172_s6, %s870_s29 }
  0x71   : > { %656 = vmatprep.subr.bf16.mxu0 %v942_v0  ;;  %676 = vmatprep.subr.bf16.mxu1 %v942_v0  ;;  %v621_v27 = vld [vmem:[%s1218_s4] ss:$0 sm:$0xff]  ;;  %p868_p3 = pneg %p867_p1  ;;  %p873_p9 = scmp.lt.s32.totalorder %s871_s17, %s865_s22 }
  0x73   : > { %p874_p12 = por %p873_p9, %p872_p7 }
  0x74   : > { %657 = vmatpush3.bf16.msra.mxu0 %v765_v3  ;;  %677 = vmatpush3.bf16.msra.mxu1 %v773_v8 }
  0x75   : > { %658 = vmatprep.subr.bf16.mxu0 %v942_v0  ;;  %678 = vmatprep.subr.bf16.mxu1 %v942_v0  ;;  %p875_p2 = pnand %p874_p12, %p868_p3 }
  0x78   : > { %659 = vmatpush3.bf16.msra.mxu0 %v766_v5  ;;  %679 = vmatpush3.bf16.msra.mxu1 %v774_v10 }
  0x79   : > { %660 = vmatprep.subr.bf16.mxu0 %v942_v0  ;;  %680 = vmatprep.subr.bf16.mxu1 %v942_v0 }
  0x7c   : > { %661 = vmatpush3.bf16.msra.mxu0 %v767_v7  ;;  %681 = vmatpush3.bf16.msra.mxu1 %v775_v12 }
  0x7d   : > { %662 = vmatprep.subr.bf16.mxu0 %v942_v0  ;;  %682 = vmatprep.subr.bf16.mxu1 %v942_v0 }
  0x80   : > { %663 = vmatpush3.bf16.msra.mxu0 %v768_v9  ;;  %683 = vmatpush3.bf16.msra.mxu1 %v776_v14 }
  0x81   : > { %664 = vmatprep.subr.bf16.mxu0 %v942_v0  ;;  %684 = vmatprep.subr.bf16.mxu1 %v942_v0 }
  0x84   : > { %665 = vmatpush3.bf16.msra.mxu0 %v769_v11  ;;  %685 = vmatpush3.bf16.msra.mxu1 %v777_v16 }
  0x85   : > { %666 = vmatprep.subr.bf16.mxu0 %v942_v0  ;;  %686 = vmatprep.subr.bf16.mxu1 %v942_v0 }
  0x88   : > { %667 = vmatpush3.bf16.msra.mxu0 %v770_v13  ;;  %687 = vmatpush3.bf16.msra.mxu1 %v778_v17 }
  0x8b   : > { %669 = vmatmul.mubr.bf16.vlgmr.msra.gmra.mrb[0].mxu0 %v270_v15 }
 0x15e   : > { %v376_v19 = vpop.f32.mrb[0].mxu0 }
 0x15f   : > { %v377_v20 = vadd.f32 %v612_v18, %v376_v19  ;;  %v670_v21 = vpop.f32.mrb[1].mxu0 }
 0x160   : > { %v379_v22 = vpop.f32.mrb[2].mxu0 }
 0x161   : > { %v382_v23 = vmul.f32 0.01, %v377_v20  ;;  %v671_v24 = vpop.f32.mrb[3].mxu0 }
 0x163   : > { %v383_v25 = vmax.f32 %v377_v20, %v382_v23 }
 0x165   : > { %v384_v26 = vpack.c.bf16 %v383_v25, %v383_v25 }
 0x167   : > { %689 = vmatmul.mubr.bf16.vlgmr.msra.gmra.mrb[0].mxu1 %v384_v26 }
 0x23a   : > { %v490_v28 = vpop.f32.mrb[0].mxu1 }
 0x23b   : > { %v491_v29 = vadd.f32 %v621_v27, %v490_v28  ;;  %v690_v30 = vpop.f32.mrb[1].mxu1 }
 0x23c   : > { %v493_v31 = vpop.f32.mrb[2].mxu1 }
 0x23d   : > { %496 = vst [vmem:[%s268_s7] sm:$0xff] %v491_v29  ;;  %v691_v32 = vpop.f32.mrb[3].mxu1 }
 0x23e   : > { %878 = shalt.err (!%p875_p2)
}
 0x23f   : > { %s879_s12 = scalar_lea.hbm %s1170_s16, 128  ;;  %s883_s8 = scalar_lea.hbm %s1219_s5, 256 }
 0x240   : > { %p880_p13 = scmp.ne.s32.totalorder %s1170_s16, %s879_s12  ;;  %p884_p4 = scmp.lt.u32.totalorder %s1170_s16, %s1219_s5 }
 0x241   : > { %p885_p5 = scmp.lt.u32.totalorder %s883_s8, %s879_s12  ;;  %p887_p11 = scmp.lt.u32.totalorder %s879_s12, %s1170_s16 }
 0x242   : > { %p881_p6 = pnand %p880_p13, %p1233_p0 }
 0x243   : > { %p886_p8 = por %p885_p5, %p884_p4 }
 0x244   : > { %p882_p10 = pneg %p881_p6 }
 0x245   : > { %p888_p1 = por %p887_p11, %p886_p8 }
 0x247   : > { %p889_p3 = pnand %p888_p1, %p882_p10 }
 0x249   : > { %892 = shalt.err (!%p889_p3)
}
 0x24a   : > { %702 = dma.vmem_to_hbm [thread:$0]  (%p1233_p0), %s1172_s6, 128, %s1170_s16, %s498_s9  }
 0x24b PF: > { %s523_s28 = sand.u32 1, %s923_s18   ;;  %p1234_p7 = scmp.ne.s32.totalorder %s1224_s25, 0 }
 0x24c   : > { %p1235_p9 = scmp.ge.s32.totalorder %s935_s21, 2  ;;  %s524_s7 = scalar_lea.sflag [#allocation4], %s523_s28 }
 0x24e   : > { %p716_p12 = pnand %p1235_p9, %p1234_p7 }
 0x250   : > { %918 = dma.done.wait (!%p716_p12), %s524_s7, 128  }
 0x251   : > { %920 = vsyncadd (!%p716_p12), %s524_s7, 4294967168  ;;  %p19_p2 = scmp.ge.s32.totalorder %s1085_s14, 4   ;;  %s1236_s18 = smov %s927_s19 }
 0x252   : > { %s1237_s19 = smov %s931_s20  ;;  %s1238_s20 = smov %s1101_s27 }
 0x253   : > { %s1239_s21 = smov %s1085_s14  ;;  %21 = sbr.rel (!%p19_p2) target bundleno = 6 (0x6), region = 93 }
 0x25a   :  { %529 = vsyncpa [#allocation3], 1 }
 0x25b   :  { %531 = vsyncpa [#allocation3 + $0x1], 1 }
 0x25c   :  { %532 = vsyncpa [#allocation6], 1 }
 0x25d   :  { %533 = vsyncpa [#allocation4], 1 }
 0x25e   :  { %535 = vsyncpa [#allocation4 + $0x1], 1 }

// kernel: tpu_custom_call.1
= control target key start
LH: loop header
LB: loop body
LE: loop exit
PB: predicated region body
PF: predicated region fallthrough
CT: control target
= control target key end

     0   :  { %10 = vsyncpa [#allocation3], 0  ;;  %s1214_s0 = inlined_call_operand.hbm [shape: bf16[16,128], index: 0, kind: input, shape index: {}]   ;;  %s1215_s1 = inlined_call_operand.hbm [shape: bf16[128,128], index: 1, kind: input, shape index: {}]   ;;  %s1216_s2 = inlined_call_operand.vmem [shape: f32[1,128], index: 2, kind: input, shape index: {}]   ;;  %s1217_s3 = inlined_call_operand.hbm [shape: bf16[128,128], index: 3, kind: input, shape index: {}]   ;;  %s1218_s4 = inlined_call_operand.vmem [shape: f32[1,128], index: 4, kind: input, shape index: {}]   ;;  %s1219_s5 = inlined_call_operand.hbm [shape: f32[16,128], index: 5, kind: output, shape index: {}]  }
   0x1   :  { %12 = vsyncpa [#allocation3 + $0x1], 0 }
   0x2   :  { %13 = vsyncpa [#allocation6], 0 }
   0x3   :  { %14 = vsyncpa [#allocation4], 0 }
   0x4   :  { %16 = vsyncpa [#allocation4 + $0x1], 0  ;;  %s975_s18 = smov 0   ;;  %s977_s19 = smov 0  }
   0x5   :  { %s979_s20 = smov 0   ;;  %s981_s21 = smov 0  }
   0x6 LB: > { %s996_s22 = sadd.s32 4294967295, %s935_s21   ;;  %s600_s23 = sadd.s32 4294967294, %s935_s21   ;;  %s935_s21 = sphi %s981_s21, %s1239_s21   ;;  %s931_s20 = sphi %s979_s20, %s1238_s20   ;;  %s927_s19 = sphi %s977_s19, %s1237_s19   ;;  %s923_s18 = sphi %s975_s18, %s1236_s18  }
   0x7   : > { %p42_p0 = scmp.ne.s32.totalorder %s927_s19, %s923_s18  ;;  %p1220_p1 = scmp.eq.s32.totalorder %s996_s22, 0 }
   0x8   : > { %p156_p3 = scmp.eq.s32.totalorder %s600_s23, 1  ;;  %p601_p5 = scmp.ge.s32.totalorder %s935_s21, 1 }
   0x9   : > { %p1005_p4 = por %p1220_p1, %p42_p0  ;;  %p163_p7 = scmp.lt.s32.totalorder %s935_s21, 3 }
   0xa   : > { %p1010_p6 = por %p156_p3, %p42_p0  ;;  %s937_s27 = smov [#allocation5]  }
   0xb   : > { %s1223_s24 = scalar_select %p1005_p4, 1, 0 }
   0xc   : > { %s1224_s25 = scalar_select %p1010_p6, 1, 0 }
   0xd   : > { %p1015_p8 = pnand %p601_p5, %p163_p7  ;;  %s175_s28 = sshll.u32 %s937_s27, 4  ;;  %s1019_s28 = int_to_ptr.vmem [resolvable:$true] %s175_s28 }
   0xe   : > { %s938_s30 = smov [#allocation7]   ;;  %s779_s9 = scalar_lea.hbm %s1215_s1, 1024 }
   0xf   : > { %p704_p9 = pneg %p1015_p8  ;;  %s191_s6 = sshll.u32 %s938_s30, 4  ;;  %s1030_s6 = int_to_ptr.vmem [resolvable:$true] %s191_s6 }
  0x10   : > { %p780_p12 = scmp.ne.s32.totalorder %s1215_s1, %s779_s9  ;;  %p786_p5 = scmp.lt.u32.totalorder %s779_s9, %s1215_s1 }
  0x11   : > { %p1026_p11 = pnand %p704_p9, %p1220_p1 }
  0x13   : > { %p781_p13 = pneg %p1026_p11 }
  0x15   : > { %p782_p0 = pnand %p781_p13, %p780_p12 }
  0x17   : > { %p783_p3 = pneg %p782_p0 }
  0x19   : > { %p788_p7 = pnand %p786_p5, %p783_p3 }
  0x1b   : > { %791 = shalt.err (!%p788_p7)
}
  0x1c   : > { %s792_s14 = scalar_lea.vmem %s1019_s28, 1024  ;;  %p800_p2 = scmp.lt.s32.totalorder %s1019_s28, %s1019_s28 }
  0x1d   : > { %p793_p9 = scmp.ne.s32.totalorder %s1019_s28, %s792_s14  ;;  %p801_p12 = scmp.lt.s32.totalorder %s792_s14, %s792_s14 }
  0x1f   : > { %p795_p10 = pnand %p793_p9, %p781_p13  ;;  %p802_p0 = por %p801_p12, %p800_p2 }
  0x21   : > { %p796_p1 = pneg %p795_p10 }
  0x23   : > { %p803_p6 = pnand %p802_p0, %p796_p1 }
  0x25   : > { %806 = shalt.err (!%p803_p6)
}
  0x26   : > { %s939_s15 = smov 64   ;;  %s940_s16 = smov 4  }
  0x27   : > { %707 = dma.hbm_to_vmem [thread:$0]  (!%p1026_p11), %s1215_s1, 1024, %s1019_s28, [#allocation6], %s939_s15, %s939_s15, %s940_s16  }
  0x28   : > { %s807_s7 = scalar_lea.hbm %s1217_s3, 1024 }
  0x29   : > { %p808_p2 = scmp.ne.s32.totalorder %s1217_s3, %s807_s7  ;;  %p814_p10 = scmp.lt.u32.totalorder %s807_s7, %s1217_s3 }
  0x2b   : > { %p810_p1 = pnand %p808_p2, %p781_p13 }
  0x2d   : > { %p811_p6 = pneg %p810_p1 }
  0x2f   : > { %p816_p3 = pnand %p814_p10, %p811_p6 }
  0x31   : > { %819 = shalt.err (!%p816_p3)
}
  0x32   : > { %s820_s28 = scalar_lea.vmem %s1030_s6, 1024  ;;  %p828_p12 = scmp.lt.s32.totalorder %s1030_s6, %s1030_s6 }
  0x33   : > { %p821_p5 = scmp.ne.s32.totalorder %s1030_s6, %s820_s28  ;;  %p829_p0 = scmp.lt.s32.totalorder %s820_s28, %s820_s28 }
  0x35   : > { %p823_p7 = pnand %p821_p5, %p781_p13  ;;  %p830_p2 = por %p829_p0, %p828_p12 }
  0x37   : > { %p824_p9 = pneg %p823_p7 }
  0x39   : > { %p831_p1 = pnand %p830_p2, %p824_p9 }
  0x3b   : > { %834 = shalt.err (!%p831_p1)
}
  0x3c   : > { %710 = dma.hbm_to_vmem [thread:$0]  (!%p1026_p11), %s1217_s3, 1024, %s1030_s6, [#allocation6], %s939_s15, %s939_s15, %s940_s16  }
  0x3d   : > { %s1085_s14 = sadd.s32 1, %s935_s21   ;;  %s29_s29 = sadd.s32 1, %s931_s20 }
  0x3e   : > { %s26_s17 = ssub.s32 %s935_s21, %s1085_s14  ;;  %p36_p13 = scmp.ne.s32.totalorder %s931_s20, %s927_s19 }
  0x3f   : > { %p27_p6 = scmp.eq.s32.totalorder %s26_s17, 0  ;;  %p37_p10 = scmp.eq.s32.totalorder %s935_s21, 0 }
  0x40   : > { %p1227_p3 = scmp.eq.s32.totalorder %s996_s22, 1  ;;  %p721_p7 = scmp.lt.s32.totalorder %s935_s21, 2 }
  0x41   : > { %s1101_s27 = scalar_select %p27_p6, %s931_s20, %s29_s29  }
  0x42   : > { %p1095_p5 = por %p1227_p3, %p36_p13  ;;  %p38_p9 = por %p37_p10, %p36_p13 }
  0x43   : > { %s208_s30 = sand.u32 1, %s931_s20   ;;  %s606_s6 = sshll.u32 %s935_s21, 6 }
  0x44   : > { %s1228_s23 = scalar_select %p1095_p5, 1, 0 }
  0x45   : > { %s605_s7 = sshll.u32 %s208_s30, 2  ;;  %s1108_s8 = scalar_lea.hbm %s1214_s0, %s606_s6 }
  0x46   : > { %s212_s9 = scalar_lea.vmem [#allocation2], %s605_s7  ;;  %p1112_p11 = pnand %p721_p7, %p38_p9 }
  0x47   : > { %s219_s10 = sshll.u32 %s212_s9, 4  ;;  %s209_s28 = scalar_lea.sflag [#allocation3], %s208_s30  ;;  %s1110_s10 = int_to_ptr.vmem [resolvable:$true] %s219_s10 }
  0x48   : > { %s835_s12 = scalar_lea.hbm %s1108_s8, 64  ;;  %p837_p0 = pneg %p1112_p11 }
  0x49   : > { %p836_p12 = scmp.ne.s32.totalorder %s1108_s8, %s835_s12  ;;  %s840_s17 = scalar_lea.hbm %s1214_s0, 128 }
  0x4a   : > { %p841_p13 = scmp.lt.u32.totalorder %s1108_s8, %s1214_s0  ;;  %p842_p6 = scmp.lt.u32.totalorder %s840_s17, %s835_s12 }
  0x4b   : > { %p838_p2 = pnand %p837_p0, %p836_p12  ;;  %p844_p3 = scmp.lt.u32.totalorder %s835_s12, %s1108_s8 }
  0x4c   : > { %p843_p10 = por %p842_p6, %p841_p13 }
  0x4d   : > { %p839_p1 = pneg %p838_p2 }
  0x4e   : > { %p845_p7 = por %p844_p3, %p843_p10 }
  0x50   : > { %p846_p9 = pnand %p845_p7, %p839_p1 }
  0x52   : > { %849 = shalt.err (!%p846_p9)
}
  0x53   : > { %s850_s30 = scalar_lea.vmem %s1110_s10, 64  ;;  %s941_s15 = smov [#allocation2]  }
  0x54   : > { %p851_p12 = scmp.ne.s32.totalorder %s1110_s10, %s850_s30  ;;  %s855_s16 = sshll.u32 %s941_s15, 4  ;;  %s856_s16 = int_to_ptr.vmem [resolvable:$false] %s855_s16 }
  0x55   : > { %s857_s9 = scalar_lea.vmem %s856_s16, 128  ;;  %p858_p4 = scmp.lt.s32.totalorder %s1110_s10, %s856_s16 }
  0x56   : > { %p853_p2 = pnand %p851_p12, %p837_p0  ;;  %p859_p13 = scmp.lt.s32.totalorder %s857_s9, %s850_s30 }
  0x58   : > { %p854_p5 = pneg %p853_p2  ;;  %p860_p6 = por %p859_p13, %p858_p4 }
  0x5a   : > { %p861_p10 = pnand %p860_p6, %p854_p5 }
  0x5c   : > { %864 = shalt.err (!%p861_p10)
}
  0x5d   : > { %714 = dma.hbm_to_vmem [thread:$0]  (!%p1112_p11), %s1108_s8, 64, %s1110_s10, %s209_s28  }
  0x5e   : > { %228 = sbr.rel (%p1015_p8) target bundleno = 587 (0x24b), region = 40  ;;  %s1144_s12 = sand.u32 (!%p1015_p8), 1, %s927_s19  }
  0x5f   : > { %s608_s13 = sshll.u32 (!%p1015_p8), %s1144_s12, 2  ;;  %s231_s29 = scalar_lea.sflag (!%p1015_p8), [#allocation3], %s1144_s12 }
  0x60   : > { %s1148_s17 = scalar_lea.vmem (!%p1015_p8), [#allocation2], %s608_s13  ;;  %p1230_p4 = scmp.ne.s32.totalorder (!%p1015_p8), %s1223_s24, 0 }
  0x65   : > { %910 = dma.done.wait (%p1230_p4), %s231_s29, 64  }
  0x66   : > { %912 = vsyncadd (%p1230_p4), %s231_s29, 4294967232  ;;  %p1231_p5 = scmp.eq.s32.totalorder %s996_s22, 0 }
  0x68   : > { %914 = dma.done.wait (%p1231_p5), [#allocation6], 2048   ;;  %p1232_p8 = pmov %p1231_p5 }
  0x69   : > { %v942_v0 = vmov 0.0   ;;  %vm943_vm0 = vmmov 0   ;;  %v763_v1 = vld [vmem:[#allocation5] sm:$0xff]   ;;  %v764_v2 = vld [vmem:[#allocation5 + $0x8] sm:$0xff]   ;;  %v765_v3 = vld [vmem:[#allocation5 + $0x10] sm:$0xff]   ;;  %s611_s8 = sshll.u32 %s1144_s12, 3 }
  0x6a   : > { %916 = vsyncadd (%p1232_p8), [#allocation6], 4294965248  ;;  %652 = vmatprep.subr.bf16.mxu0 %v942_v0  ;;  %668 = vmatprep.mubr.msk.bf16.mxu0 %vm943_vm0, %v942_v0  ;;  %v771_v4 = vld [vmem:[#allocation7] sm:$0xff]   ;;  %v766_v5 = vld [vmem:[#allocation5 + $0x18] sm:$0xff]   ;;  %s631_s28 = sshll.u32 %s996_s22, 7  ;;  %s268_s7 = scalar_lea.vmem [#allocation8], %s611_s8 }
  0x6b   : > { %672 = vmatprep.subr.bf16.mxu1 %v942_v0  ;;  %688 = vmatprep.mubr.msk.bf16.mxu1 %vm943_vm0, %v942_v0  ;;  %v772_v6 = vld [vmem:[#allocation7 + $0x8] sm:$0xff]   ;;  %v767_v7 = vld [vmem:[#allocation5 + $0x20] sm:$0xff]   ;;  %v773_v8 = vld [vmem:[#allocation7 + $0x10] sm:$0xff]   ;;  %s511_s6 = sshll.u32 %s268_s7, 4  ;;  %s1170_s16 = scalar_lea.hbm %s1219_s5, %s631_s28  ;;  %s1172_s6 = int_to_ptr.vmem [resolvable:$true] %s511_s6 }
  0x6c   : > { %653 = vmatpush3.bf16.msra.mxu0 %v763_v1  ;;  %673 = vmatpush3.bf16.msra.mxu1 %v771_v4  ;;  %v768_v9 = vld [vmem:[#allocation5 + $0x28] sm:$0xff]   ;;  %v774_v10 = vld [vmem:[#allocation7 + $0x18] sm:$0xff]   ;;  %v769_v11 = vld [vmem:[#allocation5 + $0x30] sm:$0xff]   ;;  %s498_s9 = scalar_lea.sflag [#allocation4], %s1144_s12  ;;  %s865_s22 = scalar_lea.vmem %s1172_s6, 128 }
  0x6d   : > { %654 = vmatprep.subr.bf16.mxu0 %v942_v0  ;;  %674 = vmatprep.subr.bf16.mxu1 %v942_v0  ;;  %v775_v12 = vld [vmem:[#allocation7 + $0x20] sm:$0xff]   ;;  %v770_v13 = vld [vmem:[#allocation5 + $0x38] sm:$0xff]   ;;  %v776_v14 = vld [vmem:[#allocation7 + $0x28] sm:$0xff]   ;;  %p866_p11 = scmp.ne.s32.totalorder %s1172_s6, %s865_s22  ;;  %p1233_p0 = scmp.ne.s32.totalorder %s1228_s23, 0 }
  0x6e   : > { %v270_v15 = vld [vmem:[%s1148_s17] sm:$0xf]  ;;  %v777_v16 = vld [vmem:[#allocation7 + $0x30] sm:$0xff]   ;;  %s944_s13 = smov [#allocation8]  }
  0x6f   : > { %v778_v17 = vld [vmem:[#allocation7 + $0x38] sm:$0xff]   ;;  %p867_p1 = pnand %p866_p11, %p1233_p0  ;;  %s869_s29 = sshll.u32 %s944_s13, 4  ;;  %s870_s29 = int_to_ptr.vmem [resolvable:$false] %s869_s29 }
  0x70   : > { %655 = vmatpush3.bf16.msra.mxu0 %v764_v2  ;;  %675 = vmatpush3.bf16.msra.mxu1 %v772_v6  ;;  %v612_v18 = vld [vmem:[%s1216_s2] ss:$0 sm:$0xff]  ;;  %s871_s17 = scalar_lea.vmem %s870_s29, 256  ;;  %p872_p7 = scmp.lt.s32.totalorder %s1172_s6, %s870_s29 }
  0x71   : > { %656 = vmatprep.subr.bf16.mxu0 %v942_v0  ;;  %676 = vmatprep.subr.bf16.mxu1 %v942_v0  ;;  %v621_v27 = vld [vmem:[%s1218_s4] ss:$0 sm:$0xff]  ;;  %p868_p3 = pneg %p867_p1  ;;  %p873_p9 = scmp.lt.s32.totalorder %s871_s17, %s865_s22 }
  0x73   : > { %p874_p12 = por %p873_p9, %p872_p7 }
  0x74   : > { %657 = vmatpush3.bf16.msra.mxu0 %v765_v3  ;;  %677 = vmatpush3.bf16.msra.mxu1 %v773_v8 }
  0x75   : > { %658 = vmatprep.subr.bf16.mxu0 %v942_v0  ;;  %678 = vmatprep.subr.bf16.mxu1 %v942_v0  ;;  %p875_p2 = pnand %p874_p12, %p868_p3 }
  0x78   : > { %659 = vmatpush3.bf16.msra.mxu0 %v766_v5  ;;  %679 = vmatpush3.bf16.msra.mxu1 %v774_v10 }
  0x79   : > { %660 = vmatprep.subr.bf16.mxu0 %v942_v0  ;;  %680 = vmatprep.subr.bf16.mxu1 %v942_v0 }
  0x7c   : > { %661 = vmatpush3.bf16.msra.mxu0 %v767_v7  ;;  %681 = vmatpush3.bf16.msra.mxu1 %v775_v12 }
  0x7d   : > { %662 = vmatprep.subr.bf16.mxu0 %v942_v0  ;;  %682 = vmatprep.subr.bf16.mxu1 %v942_v0 }
  0x80   : > { %663 = vmatpush3.bf16.msra.mxu0 %v768_v9  ;;  %683 = vmatpush3.bf16.msra.mxu1 %v776_v14 }
  0x81   : > { %664 = vmatprep.subr.bf16.mxu0 %v942_v0  ;;  %684 = vmatprep.subr.bf16.mxu1 %v942_v0 }
  0x84   : > { %665 = vmatpush3.bf16.msra.mxu0 %v769_v11  ;;  %685 = vmatpush3.bf16.msra.mxu1 %v777_v16 }
  0x85   : > { %666 = vmatprep.subr.bf16.mxu0 %v942_v0  ;;  %686 = vmatprep.subr.bf16.mxu1 %v942_v0 }
  0x88   : > { %667 = vmatpush3.bf16.msra.mxu0 %v770_v13  ;;  %687 = vmatpush3.bf16.msra.mxu1 %v778_v17 }
  0x8b   : > { %669 = vmatmul.mubr.bf16.vlgmr.msra.gmra.mrb[0].mxu0 %v270_v15 }
 0x15e   : > { %v376_v19 = vpop.f32.mrb[0].mxu0 }
 0x15f   : > { %v377_v20 = vadd.f32 %v612_v18, %v376_v19  ;;  %v670_v21 = vpop.f32.mrb[1].mxu0 }
 0x160   : > { %v379_v22 = vpop.f32.mrb[2].mxu0 }
 0x161   : > { %v382_v23 = vmul.f32 0.01, %v377_v20  ;;  %v671_v24 = vpop.f32.mrb[3].mxu0 }
 0x163   : > { %v383_v25 = vmax.f32 %v377_v20, %v382_v23 }
 0x165   : > { %v384_v26 = vpack.c.bf16 %v383_v25, %v383_v25 }
 0x167   : > { %689 = vmatmul.mubr.bf16.vlgmr.msra.gmra.mrb[0].mxu1 %v384_v26 }
 0x23a   : > { %v490_v28 = vpop.f32.mrb[0].mxu1 }
 0x23b   : > { %v491_v29 = vadd.f32 %v621_v27, %v490_v28  ;;  %v690_v30 = vpop.f32.mrb[1].mxu1 }
 0x23c   : > { %v493_v31 = vpop.f32.mrb[2].mxu1 }
 0x23d   : > { %496 = vst [vmem:[%s268_s7] sm:$0xff] %v491_v29  ;;  %v691_v32 = vpop.f32.mrb[3].mxu1 }
 0x23e   : > { %878 = shalt.err (!%p875_p2)
}
 0x23f   : > { %s879_s12 = scalar_lea.hbm %s1170_s16, 128  ;;  %s883_s8 = scalar_lea.hbm %s1219_s5, 256 }
 0x240   : > { %p880_p13 = scmp.ne.s32.totalorder %s1170_s16, %s879_s12  ;;  %p884_p4 = scmp.lt.u32.totalorder %s1170_s16, %s1219_s5 }
 0x241   : > { %p885_p5 = scmp.lt.u32.totalorder %s883_s8, %s879_s12  ;;  %p887_p11 = scmp.lt.u32.totalorder %s879_s12, %s1170_s16 }
 0x242   : > { %p881_p6 = pnand %p880_p13, %p1233_p0 }
 0x243   : > { %p886_p8 = por %p885_p5, %p884_p4 }
 0x244   : > { %p882_p10 = pneg %p881_p6 }
 0x245   : > { %p888_p1 = por %p887_p11, %p886_p8 }
 0x247   : > { %p889_p3 = pnand %p888_p1, %p882_p10 }
 0x249   : > { %892 = shalt.err (!%p889_p3)
}
 0x24a   : > { %702 = dma.vmem_to_hbm [thread:$0]  (%p1233_p0), %s1172_s6, 128, %s1170_s16, %s498_s9  }
 0x24b PF: > { %s523_s28 = sand.u32 1, %s923_s18   ;;  %p1234_p7 = scmp.ne.s32.totalorder %s1224_s25, 0 }
 0x24c   : > { %p1235_p9 = scmp.ge.s32.totalorder %s935_s21, 2  ;;  %s524_s7 = scalar_lea.sflag [#allocation4], %s523_s28 }
 0x24e   : > { %p716_p12 = pnand %p1235_p9, %p1234_p7 }
 0x250   : > { %918 = dma.done.wait (!%p716_p12), %s524_s7, 128  }
 0x251   : > { %920 = vsyncadd (!%p716_p12), %s524_s7, 4294967168  ;;  %p19_p2 = scmp.ge.s32.totalorder %s1085_s14, 4   ;;  %s1236_s18 = smov %s927_s19 }
 0x252   : > { %s1237_s19 = smov %s931_s20  ;;  %s1238_s20 = smov %s1101_s27 }
 0x253   : > { %s1239_s21 = smov %s1085_s14  ;;  %21 = sbr.rel (!%p19_p2) target bundleno = 6 (0x6), region = 93 }
 0x25a   :  { %529 = vsyncpa [#allocation3], 1 }
 0x25b   :  { %531 = vsyncpa [#allocation3 + $0x1], 1 }
 0x25c   :  { %532 = vsyncpa [#allocation6], 1 }
 0x25d   :  { %533 = vsyncpa [#allocation4], 1 }
 0x25e   :  { %535 = vsyncpa [#allocation4 + $0x1], 1 }

</bundles_post_ra>
